<compile_context>
chip_gen: v5e
topology: v5e:2x2
jax: 0.10.0
libtpu: 0.0.40
codegen_flags: <defaults>
</compile_context>

<pallas_src>
import jax
import jax.numpy as jnp
from jax.experimental import pallas as pl
from jax.experimental.pallas import tpu as pltpu


# ---------------------------------------------------------------------------
# Offline weight lowering: conv -> matmul matrices (BN scale folded in).
# In a real network these are parameter prep, computed once per checkpoint.
# ---------------------------------------------------------------------------
def _out_size(size, stride):
    # kernel=3/pad=1 and kernel=1/pad=0 both give this output size.
    return (size - 1) // stride + 1


def _lower_conv3x3(w, bn_scale, w_in, stride, dtype):
    """w: (3,3,Cin,Cout) HWIO -> (3*(w_in+2)*Cin, Wout*Cout).

    Row index  = kh*(w_in+2)*Cin + col*Cin + ci  over the zero-padded input row.
    Col index  = j*Cout + co                     over the packed output row.
    The conv's column stride is baked into this matrix, so the kernel only needs
    (possibly row-strided) row-band reads.
    """
    _, _, cin, cout = w.shape
    w_out = _out_size(w_in, stride)
    wf = (w * bn_scale[None, None, None, :]).astype(jnp.float32)  # fold BN scale
    j = jnp.arange(w_out)
    blocks = []
    for kh in range(3):
        zk = jnp.zeros((w_in + 2, cin, w_out, cout), jnp.float32)
        for kw in range(3):
            upd = jnp.broadcast_to(wf[kh, kw], (w_out, cin, cout))
            zk = zk.at[stride * j + kw, :, j, :].add(upd)
        blocks.append(zk.reshape((w_in + 2) * cin, w_out * cout))
    return jnp.concatenate(blocks, axis=0).astype(dtype)


def _lower_conv1x1(w, bn_scale, w_in, stride, dtype):
    """w: (Cin,Cout) -> ((w_in+2)*Cin, Wout*Cout), acting on the middle (kh=1)
    padded row-band: padded column 1 + stride*j."""
    cin, cout = w.shape
    w_out = _out_size(w_in, stride)
    wf = (w * bn_scale[None, :]).astype(jnp.float32)
    j = jnp.arange(w_out)
    z = jnp.zeros((w_in + 2, cin, w_out, cout), jnp.float32)
    z = z.at[stride * j + 1, :, j, :].add(jnp.broadcast_to(wf, (w_out, cin, cout)))
    return z.reshape((w_in + 2) * cin, w_out * cout).astype(dtype)


# ---------------------------------------------------------------------------
# Fused BasicBlock kernel (one grid step == one image).
# ---------------------------------------------------------------------------
def _make_block_kernel(H, W, Cin, Cout, stride, has_downsample):
    Ho, Wo = _out_size(H, stride), _out_size(W, stride)

    def kernel(x_ref, w1_ref, b1_ref, w2_ref, b2_ref, *rest):
        if has_downsample:
            wsc_ref, o_ref, xp1, xp2 = rest
        else:
            o_ref, xp1, xp2 = rest
        cdt = x_ref.dtype

        # ---- zero-pad the packed image (H, W*Cin) into VMEM scratch (H+2, (W+2)*Cin)
        zc1 = jnp.zeros((H, Cin), cdt)
        xp1[...] = jnp.zeros(xp1.shape, cdt)
        xp1[1:H + 1, :] = jnp.concatenate([zc1, x_ref[0], zc1], axis=1)

        # ---- conv1 + BN1 + ReLU: ONE matmul over three row-bands (row stride = stride)
        if stride == 1:
            bands = [xp1[kh:kh + Ho, :] for kh in range(3)]
        else:
            bands = [xp1[pl.ds(kh, Ho, stride), :] for kh in range(3)]
        p1 = jnp.concatenate(bands, axis=1)                     # (Ho, 3*(W+2)*Cin)
        a1 = jnp.dot(p1, w1_ref[...], preferred_element_type=jnp.float32)
        a1 = jnp.maximum(a1 + b1_ref[...], 0.0)                 # BN shift + ReLU (scale folded)

        # ---- zero-pad relu(a1) into the second scratch; conv2 + BN2 (stride 1)
        zc2 = jnp.zeros((Ho, Cout), cdt)
        xp2[...] = jnp.zeros(xp2.shape, cdt)
        xp2[1:Ho + 1, :] = jnp.concatenate([zc2, a1.astype(cdt), zc2], axis=1)
        p2 = jnp.concatenate([xp2[kh:kh + Ho, :] for kh in range(3)], axis=1)
        out = jnp.dot(p2, w2_ref[...], preferred_element_type=jnp.float32)
        out = out + b2_ref[...]                                 # shift2 (+ shortcut BN shift)

        # ---- shortcut, fused: 1x1/stride conv reuses the middle row-band; identity
        #      reuses the already-resident x block.
        if has_downsample:
            out = out + jnp.dot(bands[1], wsc_ref[...],
                                preferred_element_type=jnp.float32)
        else:
            out = out + x_ref[0].astype(jnp.float32)

        o_ref[0] = jnp.maximum(out, 0.0).astype(o_ref.dtype)    # lane-dense store

    return kernel


# ---------------------------------------------------------------------------
# Wrapper
# ---------------------------------------------------------------------------
def basic_block_forward(x_nchw, params, stride, compute_dtype=jnp.bfloat16):
    """BasicBlock forward. x_nchw: (N, Cin, H, W) (PyTorch layout)."""
    N, Cin, H, W = x_nchw.shape
    Cout = params["w1"].shape[-1]
    Ho, Wo = _out_size(H, stride), _out_size(W, stride)
    has_ds = "w_sc" in params

    # NCHW -> lane-dense packed layout (N, H, W*Cin). If blocks are chained, keep
    # activations in this packed layout between blocks and skip these transposes.
    x = jnp.transpose(x_nchw, (0, 2, 3, 1)).reshape(N, H, W * Cin).astype(compute_dtype)

    s1, sh1 = params["bn1"]
    s2, sh2 = params["bn2"]
    w1_low = _lower_conv3x3(params["w1"], s1, W, stride, compute_dtype)
    w2_low = _lower_conv3x3(params["w2"], s2, Wo, 1, compute_dtype)
    b1_row = jnp.tile(sh1, Wo).reshape(1, Wo * Cout).astype(jnp.float32)
    b2_row = jnp.tile(sh2, Wo)

    inputs = [x, w1_low, b1_row, w2_low]
    in_specs = [
        pl.BlockSpec((1, H, W * Cin), lambda n: (n, 0, 0)),
        pl.BlockSpec(w1_low.shape, lambda n: (0, 0)),
        pl.BlockSpec(b1_row.shape, lambda n: (0, 0)),
        pl.BlockSpec(w2_low.shape, lambda n: (0, 0)),
    ]
    if has_ds:
        ssc, shsc = params["bn_sc"]
        wsc_low = _lower_conv1x1(params["w_sc"], ssc, W, stride, compute_dtype)
        b2_row = b2_row + jnp.tile(shsc, Wo)      # fold shortcut BN shift into epilogue
    b2_row = b2_row.reshape(1, Wo * Cout).astype(jnp.float32)
    inputs.append(b2_row)
    in_specs.append(pl.BlockSpec(b2_row.shape, lambda n: (0, 0)))
    if has_ds:
        inputs.append(wsc_low)
        in_specs.append(pl.BlockSpec(wsc_low.shape, lambda n: (0, 0)))

    scratch_shapes = [
        pltpu.VMEM((H + 2, (W + 2) * Cin), compute_dtype),      # padded input image
        pltpu.VMEM((Ho + 2, (Wo + 2) * Cout), compute_dtype),   # padded conv1 output
    ]

    # VMEM budget: double-buffered x/out blocks + resident weights/shifts + scratch,
    # with 4x headroom; floored at 16 MiB (safe on v5e) and capped under v7x's 64 MiB.
    itemsize = jnp.dtype(compute_dtype).itemsize
    est = 2 * (H * W * Cin + Ho * Wo * Cout) * itemsize
    est += 2 * sum(int(a.size) * a.dtype.itemsize for a in inputs[1:])
    est += ((H + 2) * (W + 2) * Cin + (Ho + 2) * (Wo + 2) * Cout) * itemsize
    vmem_limit = max(16 * 1024 * 1024, min(48 * 1024 * 1024, 4 * est))

    kernel = _make_block_kernel(H, W, Cin, Cout, stride, has_ds)
    out = pl.pallas_call(
        kernel,
        out_shape=jax.ShapeDtypeStruct((N, Ho, Wo * Cout), compute_dtype),
        grid_spec=pltpu.PrefetchScalarGridSpec(
            num_scalar_prefetch=0,
            grid=(N,),
            in_specs=in_specs,
            out_specs=pl.BlockSpec((1, Ho, Wo * Cout), lambda n: (n, 0, 0)),
            scratch_shapes=scratch_shapes,
        ),
        compiler_params=pltpu.CompilerParams(
            dimension_semantics=("parallel",),
            vmem_limit_bytes=int(vmem_limit),
        ),
    )(*inputs)

    # packed (N, Ho, Wo*Cout) -> NCHW at the module boundary only.
    out = out.reshape(N, Ho, Wo, Cout).transpose(0, 3, 1, 2)
    return out.astype(x_nchw.dtype)


# ---------------------------------------------------------------------------
# Parameters + pure-JAX reference (lax.conv, f32) for verification
# ---------------------------------------------------------------------------
def _bn_params(key, c, eps=1e-5):
    k1, k2, k3 = jax.random.split(key, 3)
    gamma = 1.0 + 0.1 * jax.random.normal(k1, (c,), jnp.float32)
    beta = 0.1 * jax.random.normal(k2, (c,), jnp.float32)
    running_mean = 0.1 * jax.random.normal(k3, (c,), jnp.float32)
    running_var = jnp.ones((c,), jnp.float32)
    scale = gamma / jnp.sqrt(running_var + eps)
    shift = beta - running_mean * scale
    return scale, shift


def init_basic_block_params(key, in_planes, planes, stride):
    k = jax.random.split(key, 6)
    params = {
        "w1": jax.random.normal(k[0], (3, 3, in_planes, planes), jnp.float32)
        / jnp.sqrt(9.0 * in_planes),
        "bn1": _bn_params(k[1], planes),
        "w2": jax.random.normal(k[2], (3, 3, planes, planes), jnp.float32)
        / jnp.sqrt(9.0 * planes),
        "bn2": _bn_params(k[3], planes),
    }
    if stride != 1 or in_planes != planes:          # downsample shortcut
        params["w_sc"] = jax.random.normal(k[4], (in_planes, planes), jnp.float32) \
            / jnp.sqrt(float(in_planes))
        params["bn_sc"] = _bn_params(k[5], planes)
    return params


def _ref_conv(x, w, stride, pad):
    return jax.lax.conv_general_dilated(
        x, w, (stride, stride), ((pad, pad), (pad, pad)),
        dimension_numbers=("NHWC", "HWIO", "NHWC"))


def ref_forward(x_nchw, params, stride):
    x = jnp.transpose(x_nchw, (0, 2, 3, 1))
    s1, sh1 = params["bn1"]
    out = jnp.maximum(_ref_conv(x, params["w1"], stride, 1) * s1 + sh1, 0.0)
    s2, sh2 = params["bn2"]
    out = _ref_conv(out, params["w2"], 1, 1) * s2 + sh2
    if "w_sc" in params:
        ssc, shsc = params["bn_sc"]
        w_sc = params["w_sc"].reshape(1, 1, *params["w_sc"].shape)
        sc = _ref_conv(x, w_sc, stride, 0) * ssc + shsc
    else:
        sc = x
    out = jnp.maximum(out + sc, 0.0)
    return jnp.transpose(out, (0, 3, 1, 2))


# ---------------------------------------------------------------------------
if __name__ == "__main__":
    key = jax.random.PRNGKey(0)
    kx, kp1, kp2 = jax.random.split(key, 3)

    # PyTorch-style NCHW input: batch=2, channels=8, spatial=16x16.
    x = jax.random.normal(kx, (2, 8, 16, 16), jnp.float32)

    configs = [
        ("identity", kp1, 8, 1),     # in_planes == planes, stride=1 -> identity shortcut
        ("downsample", kp2, 16, 2),  # stride=2, planes change -> 1x1 conv shortcut
    ]
    for name, kp, planes, stride in configs:
        params = init_basic_block_params(kp, 8, planes, stride)
        ref = ref_forward(x, params, stride)

        # f32 path: tight check of the width-lowered matmul formulation.
        out_f32 = jax.block_until_ready(
            basic_block_forward(x, params, stride, compute_dtype=jnp.float32))
        assert out_f32.shape == ref.shape, f"{name}: shape mismatch {out_f32.shape}"
        assert jnp.allclose(out_f32, ref, atol=1e-3, rtol=1e-3), f"{name}: f32 mismatch"

        # bf16 path (MXU-native, default): looser tolerance for bf16 input rounding
        # (accumulation stays f32 via preferred_element_type).
        out_bf16 = jax.block_until_ready(
            basic_block_forward(x, params, stride, compute_dtype=jnp.bfloat16))
        assert out_bf16.shape == ref.shape, f"{name}: shape mismatch {out_bf16.shape}"
        assert jnp.allclose(out_bf16.astype(jnp.float32), ref,
                            atol=1e-1, rtol=1e-1), f"{name}: bf16 mismatch"

    print("KERNEL_OK")
</pallas_src>

<mosaic_0001>
module attributes {stable_mosaic.version = 11 : i64} {
  func.func @kernel(%arg0: i32, %arg1: memref<1x16x128xf32, #tpu.memory_space<vmem>>, %arg2: memref<432x128xf32, #tpu.memory_space<vmem>>, %arg3: memref<1x128xf32, #tpu.memory_space<vmem>>, %arg4: memref<432x128xf32, #tpu.memory_space<vmem>>, %arg5: memref<1x128xf32, #tpu.memory_space<vmem>>, %arg6: memref<1x16x128xf32, #tpu.memory_space<vmem>>, %arg7: memref<18x144xf32, #tpu.memory_space<vmem>>, %arg8: memref<18x144xf32, #tpu.memory_space<vmem>>) attributes {dimension_semantics = [#tpu.dimension_semantics<parallel>], iteration_bounds = array<i64: 2>, scalar_prefetch = 0 : i64, scratch_operands = 2 : i64, tpu.core_type = #tpu.core_type<tc>, window_params = [{transform_indices = @transform_0, window_bounds = array<i64: 1, 16, 128>}, {pipeline_mode = #tpu.pipeline_mode<synchronous>, transform_indices = @transform_1, window_bounds = array<i64: 432, 128>}, {pipeline_mode = #tpu.pipeline_mode<synchronous>, transform_indices = @transform_2, window_bounds = array<i64: 1, 128>}, {pipeline_mode = #tpu.pipeline_mode<synchronous>, transform_indices = @transform_3, window_bounds = array<i64: 432, 128>}, {pipeline_mode = #tpu.pipeline_mode<synchronous>, transform_indices = @transform_4, window_bounds = array<i64: 1, 128>}, {transform_indices = @transform_5, window_bounds = array<i64: 1, 16, 128>}]} {
    %cst = arith.constant 0.000000e+00 : f32
    %0 = vector.broadcast %cst : f32 to vector<16x8xf32>
    %cst_0 = arith.constant 0.000000e+00 : f32
    %1 = vector.broadcast %cst_0 : f32 to vector<18x144xf32>
    %c0 = arith.constant 0 : index
    %c0_1 = arith.constant 0 : index
    %2 = vector.load %arg7[%c0, %c0_1] : memref<18x144xf32, #tpu.memory_space<vmem>>, vector<18x144xf32>
    tpu.vector_store %arg7[%c0, %c0_1], %1 {strides = array<i32>} : memref<18x144xf32, #tpu.memory_space<vmem>>, vector<18x144xf32>,
    %c0_2 = arith.constant 0 : index
    %c0_3 = arith.constant 0 : index
    %c0_4 = arith.constant 0 : index
    %3 = vector.load %arg1[%c0_2, %c0_3, %c0_4] : memref<1x16x128xf32, #tpu.memory_space<vmem>>, vector<1x16x128xf32>
    %4 = vector.shape_cast %3 : vector<1x16x128xf32> to vector<16x128xf32>
    %5 = tpu.concatenate %0, %4, %0 in 1 : vector<16x8xf32>, vector<16x128xf32>, vector<16x8xf32> -> vector<16x144xf32>
    %c1 = arith.constant 1 : index
    %c0_5 = arith.constant 0 : index
    %6 = vector.load %arg7[%c1, %c0_5] : memref<18x144xf32, #tpu.memory_space<vmem>>, vector<16x144xf32>
    tpu.vector_store %arg7[%c1, %c0_5], %5 {strides = array<i32>} : memref<18x144xf32, #tpu.memory_space<vmem>>, vector<16x144xf32>,
    %c0_6 = arith.constant 0 : index
    %c0_7 = arith.constant 0 : index
    %7 = vector.load %arg7[%c0_6, %c0_7] : memref<18x144xf32, #tpu.memory_space<vmem>>, vector<16x144xf32>
    %c1_8 = arith.constant 1 : index
    %c0_9 = arith.constant 0 : index
    %8 = vector.load %arg7[%c1_8, %c0_9] : memref<18x144xf32, #tpu.memory_space<vmem>>, vector<16x144xf32>
    %c2 = arith.constant 2 : index
    %c0_10 = arith.constant 0 : index
    %9 = vector.load %arg7[%c2, %c0_10] : memref<18x144xf32, #tpu.memory_space<vmem>>, vector<16x144xf32>
    %10 = tpu.concatenate %7, %8, %9 in 1 : vector<16x144xf32>, vector<16x144xf32>, vector<16x144xf32> -> vector<16x432xf32>
    %c0_11 = arith.constant 0 : index
    %c0_12 = arith.constant 0 : index
    %11 = vector.load %arg2[%c0_11, %c0_12] : memref<432x128xf32, #tpu.memory_space<vmem>>, vector<432x128xf32>
    %cst_13 = arith.constant dense<0.000000e+00> : vector<16x128xf32>
    %12 = tpu.matmul %10, %11, %cst_13 {dimension_numbers = #tpu.dot_dimension_numbers<[1], [0], [0], [1], [0, 0, 1, 1], [], []>} : vector<16x432xf32>, vector<432x128xf32>, vector<16x128xf32> -> vector<16x128xf32>
    %c0_14 = arith.constant 0 : index
    %c0_15 = arith.constant 0 : index
    %13 = vector.load %arg3[%c0_14, %c0_15] : memref<1x128xf32, #tpu.memory_space<vmem>>, vector<1x128xf32>
    %14 = vector.broadcast %13 : vector<1x128xf32> to vector<16x128xf32>
    %15 = arith.addf %12, %14 : vector<16x128xf32>
    %cst_16 = arith.constant 0.000000e+00 : f32
    %16 = vector.broadcast %cst_16 : f32 to vector<16x128xf32>
    %17 = arith.maximumf %15, %16 : vector<16x128xf32>
    %cst_17 = arith.constant 0.000000e+00 : f32
    %18 = vector.broadcast %cst_17 : f32 to vector<16x8xf32>
    %cst_18 = arith.constant 0.000000e+00 : f32
    %19 = vector.broadcast %cst_18 : f32 to vector<18x144xf32>
    %c0_19 = arith.constant 0 : index
    %c0_20 = arith.constant 0 : index
    %20 = vector.load %arg8[%c0_19, %c0_20] : memref<18x144xf32, #tpu.memory_space<vmem>>, vector<18x144xf32>
    tpu.vector_store %arg8[%c0_19, %c0_20], %19 {strides = array<i32>} : memref<18x144xf32, #tpu.memory_space<vmem>>, vector<18x144xf32>,
    %21 = tpu.concatenate %18, %17, %18 in 1 : vector<16x8xf32>, vector<16x128xf32>, vector<16x8xf32> -> vector<16x144xf32>
    %c1_21 = arith.constant 1 : index
    %c0_22 = arith.constant 0 : index
    %22 = vector.load %arg8[%c1_21, %c0_22] : memref<18x144xf32, #tpu.memory_space<vmem>>, vector<16x144xf32>
    tpu.vector_store %arg8[%c1_21, %c0_22], %21 {strides = array<i32>} : memref<18x144xf32, #tpu.memory_space<vmem>>, vector<16x144xf32>,
    %c0_23 = arith.constant 0 : index
    %c0_24 = arith.constant 0 : index
    %23 = vector.load %arg8[%c0_23, %c0_24] : memref<18x144xf32, #tpu.memory_space<vmem>>, vector<16x144xf32>
    %c1_25 = arith.constant 1 : index
    %c0_26 = arith.constant 0 : index
    %24 = vector.load %arg8[%c1_25, %c0_26] : memref<18x144xf32, #tpu.memory_space<vmem>>, vector<16x144xf32>
    %c2_27 = arith.constant 2 : index
    %c0_28 = arith.constant 0 : index
    %25 = vector.load %arg8[%c2_27, %c0_28] : memref<18x144xf32, #tpu.memory_space<vmem>>, vector<16x144xf32>
    %26 = tpu.concatenate %23, %24, %25 in 1 : vector<16x144xf32>, vector<16x144xf32>, vector<16x144xf32> -> vector<16x432xf32>
    %c0_29 = arith.constant 0 : index
    %c0_30 = arith.constant 0 : index
    %27 = vector.load %arg4[%c0_29, %c0_30] : memref<432x128xf32, #tpu.memory_space<vmem>>, vector<432x128xf32>
    %cst_31 = arith.constant dense<0.000000e+00> : vector<16x128xf32>
    %28 = tpu.matmul %26, %27, %cst_31 {dimension_numbers = #tpu.dot_dimension_numbers<[1], [0], [0], [1], [0, 0, 1, 1], [], []>} : vector<16x432xf32>, vector<432x128xf32>, vector<16x128xf32> -> vector<16x128xf32>
    %c0_32 = arith.constant 0 : index
    %c0_33 = arith.constant 0 : index
    %29 = vector.load %arg5[%c0_32, %c0_33] : memref<1x128xf32, #tpu.memory_space<vmem>>, vector<1x128xf32>
    %30 = vector.broadcast %29 : vector<1x128xf32> to vector<16x128xf32>
    %31 = arith.addf %28, %30 : vector<16x128xf32>
    %c0_34 = arith.constant 0 : index
    %c0_35 = arith.constant 0 : index
    %c0_36 = arith.constant 0 : index
    %32 = vector.load %arg1[%c0_34, %c0_35, %c0_36] : memref<1x16x128xf32, #tpu.memory_space<vmem>>, vector<1x16x128xf32>
    %33 = vector.shape_cast %32 : vector<1x16x128xf32> to vector<16x128xf32>
    %34 = arith.addf %31, %33 : vector<16x128xf32>
    %cst_37 = arith.constant 0.000000e+00 : f32
    %35 = vector.broadcast %cst_37 : f32 to vector<16x128xf32>
    %36 = arith.maximumf %34, %35 : vector<16x128xf32>
    %c0_38 = arith.constant 0 : index
    %c0_39 = arith.constant 0 : index
    %c0_40 = arith.constant 0 : index
    %37 = vector.load %arg6[%c0_38, %c0_39, %c0_40] : memref<1x16x128xf32, #tpu.memory_space<vmem>>, vector<1x16x128xf32>
    %38 = vector.shape_cast %37 : vector<1x16x128xf32> to vector<16x128xf32>
    %39 = vector.shape_cast %36 : vector<16x128xf32> to vector<1x16x128xf32>
    tpu.vector_store %arg6[%c0_38, %c0_39, %c0_40], %39 {strides = array<i32>} : memref<1x16x128xf32, #tpu.memory_space<vmem>>, vector<1x16x128xf32>,
    return
  }
  func.func @transform_0(%arg0: i32) -> (i32, i32, i32) {
    %c0_i32 = arith.constant 0 : i32
    %c0_i32_0 = arith.constant 0 : i32
    %c0_i32_1 = arith.constant 0 : i32
    return %arg0, %c0_i32, %c0_i32_0 : i32, i32, i32
  }
  func.func @transform_1(%arg0: i32) -> (i32, i32) {
    %c0_i32 = arith.constant 0 : i32
    %c0_i32_0 = arith.constant 0 : i32
    %c0_i32_1 = arith.constant 0 : i32
    return %c0_i32, %c0_i32_0 : i32, i32
  }
  func.func @transform_2(%arg0: i32) -> (i32, i32) {
    %c0_i32 = arith.constant 0 : i32
    %c0_i32_0 = arith.constant 0 : i32
    %c0_i32_1 = arith.constant 0 : i32
    return %c0_i32, %c0_i32_0 : i32, i32
  }
  func.func @transform_3(%arg0: i32) -> (i32, i32) {
    %c0_i32 = arith.constant 0 : i32
    %c0_i32_0 = arith.constant 0 : i32
    %c0_i32_1 = arith.constant 0 : i32
    return %c0_i32, %c0_i32_0 : i32, i32
  }
  func.func @transform_4(%arg0: i32) -> (i32, i32) {
    %c0_i32 = arith.constant 0 : i32
    %c0_i32_0 = arith.constant 0 : i32
    %c0_i32_1 = arith.constant 0 : i32
    return %c0_i32, %c0_i32_0 : i32, i32
  }
  func.func @transform_5(%arg0: i32) -> (i32, i32, i32) {
    %c0_i32 = arith.constant 0 : i32
    %c0_i32_0 = arith.constant 0 : i32
    %c0_i32_1 = arith.constant 0 : i32
    return %arg0, %c0_i32, %c0_i32_0 : i32, i32, i32
  }
}

</mosaic_0001>

<bundles_post_ra>
// kernel: tpu_custom_call.1
= control target key start
LH: loop header
LB: loop body
LE: loop exit
PB: predicated region body
PF: predicated region fallthrough
CT: control target
= control target key end

     0   :  { %10 = vsyncpa [#allocation5], 0  ;;  %s1514_s0 = inlined_call_operand.hbm [shape: f32[2,16,128], index: 0, kind: input, shape index: {}]   ;;  %s1515_s1 = inlined_call_operand.hbm [shape: f32[432,128], index: 1, kind: input, shape index: {}]   ;;  %s1516_s2 = inlined_call_operand.vmem [shape: f32[1,128], index: 2, kind: input, shape index: {}]   ;;  %s1517_s3 = inlined_call_operand.hbm [shape: f32[432,128], index: 3, kind: input, shape index: {}]   ;;  %s1518_s4 = inlined_call_operand.vmem [shape: f32[1,128], index: 4, kind: input, shape index: {}]   ;;  %s1519_s5 = inlined_call_operand.hbm [shape: f32[2,16,128], index: 5, kind: output, shape index: {}]  }
   0x1   :  { %12 = vsyncpa [#allocation5 + $0x1], 0 }
   0x2   :  { %13 = vsyncpa [#allocation8], 0 }
   0x3   :  { %14 = vsyncpa [#allocation6], 0 }
   0x4   :  { %16 = vsyncpa [#allocation6 + $0x1], 0  ;;  %s1261_s18 = smov 0   ;;  %s1263_s19 = smov 0  }
   0x5   :  { %s1265_s20 = smov 0   ;;  %s1267_s21 = smov 0  }
   0x6 LB: > { %s1282_s22 = sadd.s32 4294967295, %s1220_s21   ;;  %s940_s23 = sadd.s32 4294967294, %s1220_s21   ;;  %s1220_s21 = sphi %s1267_s21, %s1531_s21   ;;  %s1216_s20 = sphi %s1265_s20, %s1530_s20   ;;  %s1212_s19 = sphi %s1263_s19, %s1529_s19   ;;  %s1208_s18 = sphi %s1261_s18, %s1528_s18  }
   0x7   : > { %p42_p0 = scmp.ne.s32.totalorder %s1212_s19, %s1208_s18  ;;  %p43_p1 = scmp.eq.s32.totalorder %s1282_s22, 0 }
   0x8   : > { %p150_p2 = scmp.eq.s32.totalorder %s1282_s22, 1  ;;  %p156_p3 = scmp.eq.s32.totalorder %s940_s23, 1 }
   0x9   : > { %p1291_p4 = por %p43_p1, %p42_p0  ;;  %p941_p5 = scmp.ge.s32.totalorder %s1220_s21, 1 }
   0xa   : > { %p1296_p6 = por %p156_p3, %p42_p0  ;;  %p163_p7 = scmp.lt.s32.totalorder %s1220_s21, 3 }
   0xb   : > { %s174_s28 = sshll.u32 %s1515_s1, 4  ;;  %s1222_s30 = smov [#allocation7]   ;;  %s175_s28 = int_to_ptr.hbm [resolvable:$true] %s174_s28 }
   0xc   : > { %p1304_p8 = pnand %p941_p5, %p163_p7  ;;  %s176_s6 = sshll.u32 %s1222_s30, 4  ;;  %s177_s6 = int_to_ptr.vmem [resolvable:$true] %s176_s6 }
   0xd   : > { %s191_s9 = sshll.u32 %s1517_s3, 4  ;;  %s1520_s10 = smov 128   ;;  %s192_s9 = int_to_ptr.hbm [resolvable:$true] %s191_s9 }
   0xe   : > { %p976_p9 = pneg %p1304_p8  ;;  %s1224_s11 = smov 8  }
   0xf   : > { %s1225_s12 = smov [#allocation9]   ;;  %s1323_s14 = sadd.s32 1, %s1220_s21  }
  0x10   : > { %p977_p10 = pnand %p976_p9, %p43_p1  ;;  %s193_s13 = sshll.u32 %s1225_s12, 4  ;;  %s194_s13 = int_to_ptr.vmem [resolvable:$true] %s193_s13 }
  0x11   : > { %s29_s15 = sadd.s32 1, %s1216_s20  ;;  %s26_s16 = ssub.s32 %s1220_s21, %s1323_s14 }
  0x12   : > { %979 = dma.hbm_to_vmem [thread:$0]  (!%p977_p10), %s175_s28, 6912, %s177_s6, [#allocation8], %s1520_s10, %s1520_s10, %s1224_s11  }
  0x13   : > { %982 = dma.hbm_to_vmem [thread:$0]  (!%p977_p10), %s192_s9, 6912, %s194_s13, [#allocation8], %s1520_s10, %s1520_s10, %s1224_s11  }
  0x14   : > { %p36_p12 = scmp.ne.s32.totalorder %s1216_s20, %s1212_s19  ;;  %p27_p13 = scmp.eq.s32.totalorder %s26_s16, 0 }
  0x15   : > { %p37_p0 = scmp.eq.s32.totalorder %s1220_s21, 0  ;;  %p993_p5 = scmp.lt.s32.totalorder %s1220_s21, 2 }
  0x16   : > { %p1333_p3 = por %p150_p2, %p36_p12  ;;  %s210_s26 = sand.u32 1, %s1216_s20  }
  0x17   : > { %s1339_s23 = scalar_select %p27_p13, %s1216_s20, %s29_s15  }
  0x18   : > { %p38_p7 = por %p37_p0, %p36_p12  ;;  %s945_s27 = sshll.u32 %s210_s26, 4 }
  0x19   : > { %s962_s28 = sshll.u32 %s1220_s21, 4  ;;  %s214_s8 = scalar_lea.vmem [#allocation4], %s945_s27 }
  0x1a   : > { %s219_s7 = scalar_lea.hbm %s1514_s0, %s962_s28  ;;  %s222_s9 = sshll.u32 %s214_s8, 4  ;;  %s223_s9 = int_to_ptr.vmem [resolvable:$true] %s222_s9 }
  0x1b   : > { %s220_s12 = sshll.u32 %s219_s7, 4  ;;  %p1346_p2 = pnand %p993_p5, %p38_p7  ;;  %s221_s12 = int_to_ptr.hbm [resolvable:$true] %s220_s12 }
  0x1c   : > { %s211_s15 = scalar_lea.sflag [#allocation5], %s210_s26  ;;  %s1120_s16 = sshra.s32 %s221_s12, 4  ;;  %s1121_s16 = int_to_ptr.hbm [resolvable:$true] %s1120_s16 }
  0x1d   : > { %s1122_s10 = scalar_lea.hbm %s1121_s16, 16  ;;  %p1124_p10 = pneg %p1346_p2 }
  0x1e   : > { %p1123_p9 = scmp.ne.s32.totalorder %s1121_s16, %s1122_s10  ;;  %s1127_s30 = scalar_lea.hbm %s1514_s0, 32 }
  0x1f   : > { %p1128_p0 = scmp.lt.s32.totalorder %s1121_s16, %s1514_s0  ;;  %p1129_p5 = scmp.lt.s32.totalorder %s1127_s30, %s1122_s10 }
  0x20   : > { %p1125_p12 = pnand %p1124_p10, %p1123_p9 }
  0x21   : > { %p1130_p7 = por %p1129_p5, %p1128_p0 }
  0x22   : > { %p1126_p13 = pneg %p1125_p12 }
  0x24   : > { %p1131_p11 = pnand %p1130_p7, %p1126_p13 }
  0x26   : > { %1134 = shalt.err (!%p1131_p11)
}
  0x27   : > { %s1526_s26 = smov 128   ;;  %234 = sbr.rel (%p1304_p8) target bundleno = 857 (0x359), region = 40 }
  0x28   : > { %986 = dma.hbm_to_vmem [thread:$0]  (!%p1346_p2), %s221_s12, 256, %s223_s9, %s211_s15, %s1526_s26, %s1526_s26, %s1224_s11  }
  0x29   : > { %s1366_s8 = sand.u32 (!%p1304_p8), 1, %s1212_s19  }
  0x2a   : > { %s949_s10 = sshll.u32 (!%p1304_p8), %s1366_s8, 4  ;;  %s237_s16 = scalar_lea.sflag (!%p1304_p8), [#allocation5], %s1366_s8 }
  0x2b   : > { %s240_s28 = scalar_lea.vmem (!%p1304_p8), [#allocation4], %s949_s10 }
  0x2c   : > { %1195 = dma.done.wait (%p1291_p4), %s237_s16, 256  }
  0x2d   : > { %1197 = vsyncadd (%p1291_p4), %s237_s16, 4294967040 }
  0x2e   : > { %1199 = dma.done.wait (%p43_p1), [#allocation8], 13824  }
  0x2f   : > { %1201 = vsyncadd (%p43_p1), [#allocation8], 4294953472  ;;  %vm279_vm0 = vcmask 130048   ;;  %v1226_v0 = vmov 0.0   ;;  %v1383_v1 = vld [vmem:[%s240_s28] sm:$0xff]  ;;  %v416_v2 = vld [vmem:[#allocation7 + $0x78] sm:$0xff] }
  0x30   : > { %278 = vst [vmem:[#allocation2] sm:$0xff] %v1226_v0  ;;  %s1227_s24 = smov 8   ;;  %464 = vmatpush.msra.mxu0 %v416_v2  ;;  %v415_v3 = vld [vmem:[#allocation7 + $0x70] sm:$0xff]  ;;  %v414_v4 = vld [vmem:[#allocation7 + $0x68] sm:$0xff]  ;;  %v413_v5 = vld [vmem:[#allocation7 + $0x60] sm:$0xff]  ;;  %vm284_vm1 = vcmask 123904  }
  0x31   : > { %280 = vst.msk [vmem:[#allocation2 + $0x8] sm:$0xff] %vm279_vm0, %v1226_v0  ;;  %290 = vrot.lane.b32.xlu0 %v1383_v1, %s1227_s24  ;;  %v1388_v6 = vld [vmem:[%s240_s28 + $0x8] sm:$0xff]  ;;  %v411_v8 = vld [vmem:[#allocation7 + $0x50] sm:$0xff]  ;;  %v409_v10 = vld [vmem:[#allocation7 + $0x40] sm:$0xff]  ;;  %vm296_vm2 = vcmask 64512   ;;  %vm319_vm3 = vcmask 130049  }
  0x32   : > { %282 = vst.msk [vmem:[#allocation2 + $0x18] sm:$0xff] %vm279_vm0, %v1226_v0  ;;  %465 = vmatpush.msra.mxu0 %v415_v3  ;;  %v412_v7 = vld [vmem:[#allocation7 + $0x58] sm:$0xff]  ;;  %v410_v9 = vld [vmem:[#allocation7 + $0x48] sm:$0xff]  ;;  %v407_v12 = vld [vmem:[#allocation7 + $0x30] sm:$0xff]  ;;  %vm305_vm4 = vcmask 1040384   ;;  %vm324_vm5 = vcmask 122880  }
  0x33   : > { %283 = vst [vmem:[#allocation2 + $0x20] sm:$0x3] %v1226_v0  ;;  %v408_v11 = vld [vmem:[#allocation7 + $0x38] sm:$0xff]  ;;  %v406_v13 = vld [vmem:[#allocation7 + $0x28] sm:$0xff]  ;;  %v405_v14 = vld [vmem:[#allocation7 + $0x20] sm:$0xff]  ;;  %vm344_vm6 = vcmask 1046528  }
  0x34   : > { %558 = vst [vmem:[#allocation3] sm:$0xff] %v1226_v0  ;;  %466 = vmatpush.msra.mxu0 %v414_v4  ;;  %v404_v15 = vld [vmem:[#allocation7 + $0x18] sm:$0xff]  ;;  %v403_v16 = vld [vmem:[#allocation7 + $0x10] sm:$0xff]  ;;  %v402_v17 = vld [vmem:[#allocation7 + $0x8] sm:$0xff]  ;;  %vm373_vm7 = vcmask 1045504   ;;  %s1228_s29 = smov 32  }
  0x35   : > { %559 = vst.msk [vmem:[#allocation3 + $0x8] sm:$0xff] %vm279_vm0, %v1226_v0  ;;  %v401_v18 = vld [vmem:[#allocation7] sm:$0xff]  ;;  %v432_v32 = vld [vmem:[#allocation7 + $0xf8] sm:$0xff]  ;;  %s1229_s11 = smov 16   ;;  %v430_v2 = vld [vmem:[#allocation7 + $0xe8] sm:$0xff]  ;;  %vm459_vm8 = vcmask 392192  }
  0x36   : > { %561 = vst.msk [vmem:[#allocation3 + $0x18] sm:$0xff] %vm279_vm0, %v1226_v0  ;;  %467 = vmatpush.msra.mxu0 %v413_v5  ;;  %487 = vmatpush.msra.mxu1 %v432_v32  ;;  %v448_v3 = vld [vmem:[#allocation7 + $0x178] sm:$0xff]  ;;  %v447_v4 = vld [vmem:[#allocation7 + $0x170] sm:$0xff]  ;;  %v429_v5 = vld [vmem:[#allocation7 + $0xe0] sm:$0xff]  ;;  %vm392_vm9 = vcmask 261120   ;;  %s963_s27 = sshll.u32 %s1282_s22, 4 }
  0x37   : > { %562 = vst [vmem:[#allocation3 + $0x20] sm:$0x3] %v1226_v0  ;;  %510 = vmatpush.msra.mxu2 %v448_v3  ;;  %v452_v32 = vld [vmem:[#allocation7 + $0x198] sm:$0xff]  ;;  %s277_s30 = scalar_lea.vmem [#allocation10], %s949_s10  ;;  %s844_s26 = scalar_lea.hbm %s1519_s5, %s963_s27 }
  0x38   : > { %468 = vmatpush.msra.mxu0 %v412_v7  ;;  %285 = vst.msk [vmem:[#allocation2 + $0x28] sm:$0x3] %vm284_vm1, %v1226_v0  ;;  %v428_v7 = vld [vmem:[#allocation7 + $0xd8] sm:$0xff]  ;;  %s845_s16 = sshll.u32 %s277_s30, 4  ;;  %s847_s28 = sshll.u32 %s844_s26, 4  ;;  %s846_s16 = int_to_ptr.vmem [resolvable:$true] %s845_s16  ;;  %s848_s28 = int_to_ptr.hbm [resolvable:$true] %s847_s28 }
  0x39   : > { %292 = vrot.lane.b32.xlu0 %v1388_v6, %s1227_s24  ;;  %563 = vst.msk [vmem:[#allocation3 + $0x28] sm:$0x3] %vm284_vm1, %v1226_v0  ;;  %v431_v0 = vld [vmem:[#allocation7 + $0xf0] sm:$0xff]  ;;  %511 = vmatpush.msra.mxu2 %v447_v4  ;;  %v679_v3 = vld [vmem:[#allocation9 + $0x48] sm:$0xff]  ;;  %s833_s22 = scalar_lea.sflag [#allocation6], %s1366_s8  ;;  %s1170_s12 = scalar_lea.hbm %s1519_s5, 32 }
  0x3a   : > { %469 = vmatpush.msra.mxu0 %v411_v8  ;;  %488 = vmatpush.msra.mxu1 %v431_v0  ;;  %v427_v8 = vld [vmem:[#allocation7 + $0xd0] sm:$0xff] }
  0x3c   : > { %470 = vmatpush.msra.mxu0 %v410_v9  ;;  %489 = vmatpush.msra.mxu1 %v430_v2  ;;  %v446_v9 = vld [vmem:[#allocation7 + $0x168] sm:$0xff]  ;;  %v1058_v2 = vld [vmem:[%s1516_s2] ss:$0 sm:$0xff] }
  0x3d   : > { %512 = vmatpush.msra.mxu2 %v446_v9 }
  0x3e   : > { %471 = vmatpush.msra.mxu0 %v409_v10  ;;  %490 = vmatpush.msra.mxu1 %v429_v5  ;;  %v426_v10 = vld [vmem:[#allocation7 + $0xc8] sm:$0xff]  ;;  %v678_v5 = vld [vmem:[#allocation9 + $0x40] sm:$0xff] }
  0x40   : > { %472 = vmatpush.msra.mxu0 %v408_v11  ;;  %491 = vmatpush.msra.mxu1 %v428_v7  ;;  %v445_v11 = vld [vmem:[#allocation7 + $0x160] sm:$0xff] }
  0x41   : > { %513 = vmatpush.msra.mxu2 %v445_v11 }
  0x42   : > { %473 = vmatpush.msra.mxu0 %v407_v12  ;;  %492 = vmatpush.msra.mxu1 %v427_v8  ;;  %v425_v12 = vld [vmem:[#allocation7 + $0xc0] sm:$0xff]  ;;  %v677_v8 = vld [vmem:[#allocation9 + $0x38] sm:$0xff] }
  0x44   : > { %474 = vmatpush.msra.mxu0 %v406_v13  ;;  %v444_v13 = vld [vmem:[#allocation7 + $0x158] sm:$0xff]  ;;  %493 = vmatpush.msra.mxu1 %v426_v10  ;;  %v676_v10 = vld [vmem:[#allocation9 + $0x30] sm:$0xff] }
  0x45   : > { %514 = vmatpush.msra.mxu2 %v444_v13 }
  0x46   : > { %475 = vmatpush.msra.mxu0 %v405_v14  ;;  %v424_v14 = vld [vmem:[#allocation7 + $0xb8] sm:$0xff]  ;;  %494 = vmatpush.msra.mxu1 %v425_v12 }
  0x48   : > { %476 = vmatpush.msra.mxu0 %v404_v15  ;;  %v443_v15 = vld [vmem:[#allocation7 + $0x150] sm:$0xff]  ;;  %495 = vmatpush.msra.mxu1 %v424_v14 }
  0x49   : > { %515 = vmatpush.msra.mxu2 %v443_v15 }
  0x4a   : > { %477 = vmatpush.msra.mxu0 %v403_v16  ;;  %v423_v16 = vld [vmem:[#allocation7 + $0xb0] sm:$0xff] }
  0x4b   : > { %496 = vmatpush.msra.mxu1 %v423_v16 }
  0x4c   : > { %478 = vmatpush.msra.mxu0 %v402_v17  ;;  %v442_v17 = vld [vmem:[#allocation7 + $0x148] sm:$0xff] }
  0x4d   : > { %516 = vmatpush.msra.mxu2 %v442_v17 }
  0x4e   : > { %479 = vmatpush.msra.mxu0 %v401_v18  ;;  %v422_v18 = vld [vmem:[#allocation7 + $0xa8] sm:$0xff] }
  0x4f   : > { %497 = vmatpush.msra.mxu1 %v422_v18 }
  0xa3   : > { %v291_v19 = vpop.permute.xlu0 %290 }
  0xa4   : > { %v297_v20 = vsel %vm296_vm2, 0.0, %v291_v19  ;;  %v299_v21 = vsel %vm296_vm2, %v291_v19, 0.0  ;;  %v441_v19 = vld [vmem:[#allocation7 + $0x140] sm:$0xff] }
  0xa5   : > { %v306_v22 = vrot.slane %v297_v20, 7  ;;  %v307_v23 = vrot.slane %v299_v21, 7  ;;  %v421_v20 = vld [vmem:[#allocation7 + $0xa0] sm:$0xff]  ;;  %v440_v21 = vld [vmem:[#allocation7 + $0x138] sm:$0xff]  ;;  %517 = vmatpush.msra.mxu2 %v441_v19 }
  0xa6   : > { %498 = vmatpush.msra.mxu1 %v421_v20 }
  0xa7   : > { %318 = vst [vmem:[#allocation2] sm:$0xfe] %v306_v22  ;;  %518 = vmatpush.msra.mxu2 %v440_v21 }
  0xa8   : > { %320 = vst.msk [vmem:[#allocation2 + $0x8] sm:$0xfe] %vm319_vm3, %v307_v23 }
  0xab   : > { %v293_v24 = vpop.permute.xlu0 %292 }
  0xac   : > { %v298_v25 = vsel %vm296_vm2, 0.0, %v293_v24  ;;  %v300_v26 = vsel %vm296_vm2, %v293_v24, 0.0  ;;  %v419_v24 = vld [vmem:[#allocation7 + $0x90] sm:$0xff] }
  0xad   : > { %v308_v27 = vrot.slane %v298_v25, 7  ;;  %v310_v28 = vrot.slane %v300_v26, 7  ;;  %v438_v25 = vld [vmem:[#allocation7 + $0x128] sm:$0xff] }
  0xae   : > { %v326_v29 = vld [vmem:[#allocation2] sm:$0xff]  ;;  %v454_v26 = vld [vmem:[#allocation7 + $0x1a8] sm:$0xff] }
  0xaf   : > { %v309_v30 = vsel %vm305_vm4, %v306_v22, %v308_v27  ;;  %v311_v31 = vsel %vm305_vm4, %v307_v23, %v310_v28  ;;  %323 = vst [vmem:[#allocation2 + $0x20] sm:$0x1] %v308_v27  ;;  %480 = vmatmul.f32.vlgmr.msra.gmra.mxu0 %v326_v29  ;;  %v330_v33 = vld [vmem:[#allocation2] sm:$0xfe]  ;;  %v335_v34 = vld [vmem:[#allocation2 + $0x8] sm:$0xfc]  ;;  %543 = vmatpush.msra.mxu3 %v454_v26 }
  0xb0   : > { %322 = vst.msk [vmem:[#allocation2 + $0x18] sm:$0xff] %vm279_vm0, %v311_v31  ;;  %v346_v35 = vrot.slane %v309_v30, 1  ;;  %v331_v37 = vld [vmem:[#allocation2 + $0x8] sm:$0xfe]  ;;  %v345_v38 = vrot.slane %v330_v33, 1  ;;  %v375_v39 = vrot.slane %v309_v30, 2 }
  0xb1   : > { %325 = vst.msk [vmem:[#allocation2 + $0x28] sm:$0x1] %vm324_vm5, %v310_v28  ;;  %v377_v42 = vrot.slane %v335_v34, 2  ;;  %v348_v46 = vrot.slane %v331_v37, 1  ;;  %v334_v55 = vld [vmem:[#allocation2] sm:$0xfc] }
  0xb2   : > { %v347_v49 = vsel %vm344_vm6, %v345_v38, %v346_v35  ;;  %v374_v58 = vrot.slane %v334_v55, 2  ;;  %v420_v22 = vld [vmem:[#allocation7 + $0x98] sm:$0xff]  ;;  %v439_v23 = vld [vmem:[#allocation7 + $0x130] sm:$0xff]  ;;  %v418_v27 = vld [vmem:[#allocation7 + $0x88] sm:$0xff] }
  0xb3   : > { %499 = vmatpush.msra.mxu1 %v420_v22  ;;  %519 = vmatpush.msra.mxu2 %v439_v23  ;;  %v437_v28 = vld [vmem:[#allocation7 + $0x120] sm:$0xff]  ;;  %v436_v31 = vld [vmem:[#allocation7 + $0x118] sm:$0xff]  ;;  %v435_v33 = vld [vmem:[#allocation7 + $0x110] sm:$0xff] }
  0xb4   : > { %v376_v60 = vsel %vm373_vm7, %v374_v58, %v375_v39  ;;  %v453_v29 = vld [vmem:[#allocation7 + $0x1a0] sm:$0xff]  ;;  %v451_v34 = vld [vmem:[#allocation7 + $0x190] sm:$0xff] }
  0xb5   : > { %500 = vmatpush.msra.mxu1 %v419_v24  ;;  %520 = vmatpush.msra.mxu2 %v438_v25  ;;  %v433_v37 = vld [vmem:[#allocation7 + $0x100] sm:$0xff]  ;;  %v675_v25 = vld [vmem:[#allocation9 + $0x28] sm:$0xff]  ;;  %v674_v26 = vld [vmem:[#allocation9 + $0x20] sm:$0xff] }
  0xb6   : > { %v336_v36 = vld [vmem:[#allocation2 + $0x20] sm:$0x3]  ;;  %544 = vmatpush.msra.mxu3 %v453_v29  ;;  %v671_v29 = vld [vmem:[#allocation9 + $0x8] sm:$0xff] }
  0xb7   : > { %483 = vmatmul.f32.gmra.mxu0 %v309_v30  ;;  %v380_v40 = vrot.slane %v336_v36, 2  ;;  %v1401_v41 = vld [vmem:[#allocation2 + $0x18] sm:$0xff]  ;;  %v332_v43 = vld [vmem:[#allocation2 + $0x20] sm:$0x1]  ;;  %501 = vmatpush.msra.mxu1 %v418_v27  ;;  %v450_v36 = vld [vmem:[#allocation7 + $0x188] sm:$0xff] }
  0xb8   : > { %v378_v45 = vrot.slane %v1401_v41, 2  ;;  %v349_v47 = vrot.slane %v1401_v41, 1  ;;  %v333_v48 = vld [vmem:[#allocation2 + $0x28] sm:$0x1]  ;;  %v351_v52 = vrot.slane %v332_v43, 1  ;;  %521 = vmatpush.msra.mxu2 %v437_v28  ;;  %v417_v30 = vld [vmem:[#allocation7 + $0x80] sm:$0xff]  ;;  %545 = vmatpush.msra.mxu3 %v452_v32 }
  0xb9   : > { %v381_v44 = vsel %vm373_vm7, %v375_v39, %v380_v40  ;;  %v353_v53 = vrot.slane %v333_v48, 1  ;;  %v337_v61 = vld [vmem:[#allocation2 + $0x28] sm:$0x3]  ;;  %502 = vmatpush.msra.mxu1 %v417_v30  ;;  %v449_v38 = vld [vmem:[#allocation7 + $0x180] sm:$0xff]  ;;  %v670_v30 = vld [vmem:[#allocation9] sm:$0xff] }
  0xba   : > { %388 = vrot.lane.b32.xlu0 %v381_v44, %s1228_s29  ;;  %v379_v50 = vsel %vm373_vm7, %v377_v42, %v378_v45  ;;  %v350_v51 = vsel %vm344_vm6, %v348_v46, %v349_v47  ;;  %v352_v56 = vsel %vm344_vm6, %v346_v35, %v351_v52  ;;  %v382_v62 = vrot.slane %v337_v61, 2  ;;  %522 = vmatpush.msra.mxu2 %v436_v31  ;;  %v434_v35 = vld [vmem:[#allocation7 + $0x108] sm:$0xff]  ;;  %v683_v61 = vld [vmem:[#allocation9 + $0x68] sm:$0xff]  ;;  %v672_v28 = vld [vmem:[#allocation9 + $0x10] sm:$0xff] }
  0xbb   : > { %386 = vrot.lane.b32.xlu2 %v379_v50, %s1228_s29  ;;  %v1038_v54 = vpack.i.bf16 %v350_v51, %v347_v49  ;;  %v354_v57 = vsel %vm344_vm6, %v349_v47, %v353_v53  ;;  %546 = vmatpush.msra.mxu3 %v451_v34  ;;  %v327_v43 = vld [vmem:[#allocation2 + $0x8] sm:$0xff] }
  0xbc   : > { %v1043_v59 = vpack.i.bf16 %v354_v57, %v352_v56  ;;  %v383_v63 = vsel %vm373_vm7, %v378_v45, %v382_v62  ;;  %523 = vmatpush.msra.mxu2 %v435_v33  ;;  %v682_v62 = vld [vmem:[#allocation9 + $0x60] sm:$0xff]  ;;  %v673_v27 = vld [vmem:[#allocation9 + $0x18] sm:$0xff] }
  0xbd   : > { %1039 = vrot.lane.b32.xlu1 %v1038_v54, %s1229_s11  ;;  %547 = vmatpush.msra.mxu3 %v450_v36 }
  0xbe   : > { %524 = vmatpush.msra.mxu2 %v434_v35 }
  0xbf   : > { %548 = vmatpush.msra.mxu3 %v449_v38  ;;  %v717_v38 = vld [vmem:[#allocation9 + $0x178] sm:$0xff] }
  0xc0   : > { %525 = vmatpush.msra.mxu2 %v433_v37  ;;  %v701_v37 = vld [vmem:[#allocation9 + $0xf8] sm:$0xff]  ;;  %778 = vmatpush.msrb.mxu1 %v717_v38  ;;  %v691_v38 = vld [vmem:[#allocation9 + $0xa8] sm:$0xff] }
  0xc1   : > { %755 = vmatpush.msrb.mxu0 %v701_v37  ;;  %v719_v37 = vld [vmem:[#allocation9 + $0x188] sm:$0xff] }
  0xc3   : > { %1044 = vrot.lane.b32.xlu2 %v1043_v59, %s1229_s11  ;;  %v685_v59 = vld [vmem:[#allocation9 + $0x78] sm:$0xff] }
  0xc4   : > { %732 = vmatpush.msrb.mxu3 %v685_v59 }
  0xc5   : > { %384 = vrot.lane.b32.xlu1 %v376_v60, %s1228_s29  ;;  %v684_v60 = vld [vmem:[#allocation9 + $0x70] sm:$0xff] }
  0xc6   : > { %733 = vmatpush.msrb.mxu3 %v684_v60 }
  0xc8   : > { %734 = vmatpush.msrb.mxu3 %v683_v61 }
  0xca   : > { %735 = vmatpush.msrb.mxu3 %v682_v62 }
  0xcd   : > { %390 = vrot.lane.b32.xlu1 %v383_v63, %s1228_s29  ;;  %v680_v63 = vld [vmem:[#allocation9 + $0x50] sm:$0xff] }
 0x115   : > { %v387_v39 = vpop.permute.xlu2 %386 }
 0x11d   : > { %v1045_v45 = vpop.permute.xlu2 %1044 }
 0x11e   : > { %v1046_v47 = vunpack.i.l.bf16 %v1045_v45  ;;  %v1047_v53 = vunpack.i.h.bf16 %v1045_v45 }
 0x120   : > { %v398_v52 = vsel %vm279_vm0, %v1401_v41, %v1046_v47  ;;  %v364_v56 = vsel %vm279_vm0, %v1046_v47, %v1047_v53  ;;  %v681_v41 = vld [vmem:[#allocation9 + $0x58] sm:$0xff] }
 0x121   : > { %736 = vmatpush.msrb.mxu3 %v681_v41 }
 0x123   : > { %737 = vmatpush.msrb.mxu3 %v680_v63 }
 0x125   : > { %738 = vmatpush.msrb.mxu3 %v679_v3 }
 0x127   : > { %739 = vmatpush.msrb.mxu3 %v678_v5 }
 0x129   : > { %740 = vmatpush.msrb.mxu3 %v677_v8 }
 0x12b   : > { %741 = vmatpush.msrb.mxu3 %v676_v10 }
 0x12c   : > { %v389_v54 = vpop.permute.xlu0 %388  ;;  %v481_v0 = vpop.f32.mrf.mxu0 }
 0x12d   : > { %v400_v57 = vsel %vm392_vm9, %v364_v56, %v389_v54  ;;  %v482_v7 = vadd.f32 %v1058_v2, %v481_v0  ;;  %742 = vmatpush.msrb.mxu3 %v675_v25  ;;  %v695_v25 = vld [vmem:[#allocation9 + $0xc8] sm:$0xff] }
 0x12f   : > { %v1040_v40 = vpop.permute.xlu1 %1039  ;;  %743 = vmatpush.msrb.mxu3 %v674_v26  ;;  %v711_v26 = vld [vmem:[#allocation9 + $0x148] sm:$0xff] }
 0x130   : > { %v1041_v42 = vunpack.i.l.bf16 %v1040_v40  ;;  %v1042_v46 = vunpack.i.h.bf16 %v1040_v40 }
 0x131   : > { %744 = vmatpush.msrb.mxu3 %v673_v27  ;;  %v723_v27 = vld [vmem:[#allocation9 + $0x1a8] sm:$0xff] }
 0x132   : > { %v397_v44 = vsel %vm279_vm0, %v327_v43, %v1041_v42  ;;  %v363_v49 = vsel %vm279_vm0, %v1041_v42, %v1042_v46  ;;  %811 = vmatpush.msrb.mxu2 %v723_v27 }
 0x133   : > { %503 = vmatmul.f32.vlgmr.msra.gmra.mxu1 %v397_v44  ;;  %745 = vmatpush.msrb.mxu3 %v672_v28  ;;  %v722_v28 = vld [vmem:[#allocation9 + $0x1a0] sm:$0xff] }
 0x134   : > { %v484_v14 = vpop.f32.mrf.mxu0  ;;  %812 = vmatpush.msrb.mxu2 %v722_v28 }
 0x135   : > { %v485_v17 = vadd.f32 %v1058_v2, %v484_v14  ;;  %746 = vmatpush.msrb.mxu3 %v671_v29  ;;  %v694_v29 = vld [vmem:[#allocation9 + $0xc0] sm:$0xff] }
 0x137   : > { %v385_v48 = vpop.permute.xlu1 %384  ;;  %747 = vmatpush.msrb.mxu3 %v670_v30  ;;  %v710_v30 = vld [vmem:[#allocation9 + $0x140] sm:$0xff] }
 0x138   : > { %v399_v50 = vsel %vm392_vm9, %v363_v49, %v385_v48  ;;  %v393_v51 = vsel %vm392_vm9, %v385_v48, %v387_v39 }
 0x139   : > { %526 = vmatmul.f32.vlgmr.msra.gmra.mxu2 %v399_v50  ;;  %953 = vmatmul.msk.f32.vlgmr.msra.gmra.mxu3 %vm459_vm8, %v393_v51 }
 0x13b   : > { %506 = vmatmul.f32.gmra.mxu1 %v398_v52 }
 0x13f   : > { %v391_v55 = vpop.permute.xlu1 %390 }
 0x140   : > { %v394_v58 = vsel %vm392_vm9, %v389_v54, %v391_v55 }
 0x141   : > { %529 = vmatmul.f32.gmra.mxu2 %v400_v57  ;;  %954 = vmatmul.msk.f32.gmra.mxu3 %vm459_vm8, %v394_v58 }
 0x1b0   : > { %v504_v4 = vpop.f32.mrf.mxu1 }
 0x1b1   : > { %v505_v9 = vadd.f32 %v504_v4, %v482_v7 }
 0x1b8   : > { %v507_v16 = vpop.f32.mrf.mxu1 }
 0x1b9   : > { %v508_v19 = vadd.f32 %v507_v16, %v485_v17  ;;  %v716_v16 = vld [vmem:[#allocation9 + $0x170] sm:$0xff]  ;;  %v699_v17 = vld [vmem:[#allocation9 + $0xe8] sm:$0xff] }
 0x1ba   : > { %779 = vmatpush.msrb.mxu1 %v716_v16 }
 0x1bc   : > { %v527_v11 = vpop.f32.mrf.mxu2  ;;  %v550_v12 = vpop.f32.mrf.mxu3 }
 0x1bd   : > { %v528_v13 = vadd.f32 %v527_v11, %v505_v9 }
 0x1bf   : > { %v551_v15 = vadd.f32 %v550_v12, %v528_v13 }
 0x1c1   : > { %v556_v18 = vmax.f32 %v551_v15, 0.0  ;;  %v700_v15 = vld [vmem:[#allocation9 + $0xf0] sm:$0xff] }
 0x1c2   : > { %756 = vmatpush.msrb.mxu0 %v700_v15 }
 0x1c3   : > { %566 = vrot.lane.b32.xlu2 %v556_v18, %s1227_s24  ;;  %v715_v18 = vld [vmem:[#allocation9 + $0x168] sm:$0xff] }
 0x1c4   : > { %v530_v20 = vpop.f32.mrf.mxu2  ;;  %v553_v22 = vpop.f32.mrf.mxu3  ;;  %757 = vmatpush.msrb.mxu0 %v699_v17  ;;  %780 = vmatpush.msrb.mxu1 %v715_v18 }
 0x1c5   : > { %v531_v21 = vadd.f32 %v530_v20, %v508_v19  ;;  %v698_v19 = vld [vmem:[#allocation9 + $0xe0] sm:$0xff] }
 0x1c6   : > { %v714_v20 = vld [vmem:[#allocation9 + $0x160] sm:$0xff]  ;;  %758 = vmatpush.msrb.mxu0 %v698_v19 }
 0x1c7   : > { %v554_v23 = vadd.f32 %v553_v22, %v531_v21  ;;  %v697_v21 = vld [vmem:[#allocation9 + $0xd8] sm:$0xff]  ;;  %781 = vmatpush.msrb.mxu1 %v714_v20 }
 0x1c8   : > { %v713_v22 = vld [vmem:[#allocation9 + $0x158] sm:$0xff]  ;;  %759 = vmatpush.msrb.mxu0 %v697_v21 }
 0x1c9   : > { %v557_v24 = vmax.f32 %v554_v23, 0.0  ;;  %782 = vmatpush.msrb.mxu1 %v713_v22  ;;  %v696_v23 = vld [vmem:[#allocation9 + $0xd0] sm:$0xff] }
 0x1ca   : > { %760 = vmatpush.msrb.mxu0 %v696_v23 }
 0x1cb   : > { %568 = vrot.lane.b32.xlu0 %v557_v24, %s1227_s24  ;;  %v712_v24 = vld [vmem:[#allocation9 + $0x150] sm:$0xff] }
 0x1cc   : > { %783 = vmatpush.msrb.mxu1 %v712_v24  ;;  %761 = vmatpush.msrb.mxu0 %v695_v25 }
 0x1ce   : > { %784 = vmatpush.msrb.mxu1 %v711_v26  ;;  %762 = vmatpush.msrb.mxu0 %v694_v29 }
 0x1d0   : > { %785 = vmatpush.msrb.mxu1 %v710_v30 }
 0x21d   : > { %v567_v31 = vpop.permute.xlu2 %566 }
 0x21e   : > { %v572_v32 = vsel %vm296_vm2, 0.0, %v567_v31  ;;  %v574_v33 = vsel %vm296_vm2, %v567_v31, 0.0  ;;  %v721_v31 = vld [vmem:[#allocation9 + $0x198] sm:$0xff] }
 0x21f   : > { %v580_v34 = vrot.slane %v572_v32, 7  ;;  %v581_v35 = vrot.slane %v574_v33, 7  ;;  %v693_v32 = vld [vmem:[#allocation9 + $0xb8] sm:$0xff]  ;;  %813 = vmatpush.msrb.mxu2 %v721_v31 }
 0x220   : > { %v709_v33 = vld [vmem:[#allocation9 + $0x138] sm:$0xff]  ;;  %763 = vmatpush.msrb.mxu0 %v693_v32 }
 0x221   : > { %592 = vst [vmem:[#allocation3] sm:$0xfe] %v580_v34  ;;  %786 = vmatpush.msrb.mxu1 %v709_v33 }
 0x222   : > { %593 = vst.msk [vmem:[#allocation3 + $0x8] sm:$0xfe] %vm319_vm3, %v581_v35 }
 0x228   : > { %v598_v36 = vld [vmem:[#allocation3] sm:$0xff] }
 0x229   : > { %748 = vmatmul.f32.vlgmr.msrb.gmra.mxu3 %v598_v36  ;;  %v606_v45 = vld [vmem:[#allocation3] sm:$0xfc]  ;;  %v607_v51 = vld [vmem:[#allocation3 + $0x8] sm:$0xfc]  ;;  %v708_v36 = vld [vmem:[#allocation9 + $0x130] sm:$0xff] }
 0x22a   : > { %v644_v49 = vrot.slane %v606_v45, 2  ;;  %v602_v52 = vld [vmem:[#allocation3] sm:$0xfe]  ;;  %v603_v53 = vld [vmem:[#allocation3 + $0x8] sm:$0xfe]  ;;  %v647_v58 = vrot.slane %v607_v51, 2  ;;  %787 = vmatpush.msrb.mxu1 %v708_v36 }
 0x22b   : > { %v616_v59 = vrot.slane %v602_v52, 1  ;;  %v619_v61 = vrot.slane %v603_v53, 1  ;;  %v705_v45 = vld [vmem:[#allocation9 + $0x118] sm:$0xff]  ;;  %v702_v51 = vld [vmem:[#allocation9 + $0x100] sm:$0xff] }
 0x23d   : > { %v569_v39 = vpop.permute.xlu0 %568 }
 0x23e   : > { %v573_v40 = vsel %vm296_vm2, 0.0, %v569_v39  ;;  %v575_v42 = vsel %vm296_vm2, %v569_v39, 0.0  ;;  %v707_v39 = vld [vmem:[#allocation9 + $0x128] sm:$0xff] }
 0x23f   : > { %v582_v43 = vrot.slane %v573_v40, 7  ;;  %v584_v44 = vrot.slane %v575_v42, 7  ;;  %v718_v40 = vld [vmem:[#allocation9 + $0x180] sm:$0xff]  ;;  %788 = vmatpush.msrb.mxu1 %v707_v39 }
 0x240   : > { %v690_v42 = vld [vmem:[#allocation9 + $0xa0] sm:$0xff] }
 0x241   : > { %v583_v46 = vsel %vm305_vm4, %v580_v34, %v582_v43  ;;  %v585_v47 = vsel %vm305_vm4, %v581_v35, %v584_v44  ;;  %596 = vst [vmem:[#allocation3 + $0x20] sm:$0x1] %v582_v43  ;;  %v720_v34 = vld [vmem:[#allocation9 + $0x190] sm:$0xff]  ;;  %v706_v43 = vld [vmem:[#allocation9 + $0x120] sm:$0xff] }
 0x242   : > { %v645_v48 = vrot.slane %v583_v46, 2  ;;  %751 = vmatmul.f32.gmra.mxu3 %v583_v46  ;;  %595 = vst.msk [vmem:[#allocation3 + $0x18] sm:$0xff] %vm279_vm0, %v585_v47  ;;  %v617_v55 = vrot.slane %v583_v46, 1  ;;  %v692_v35 = vld [vmem:[#allocation9 + $0xb0] sm:$0xff]  ;;  %814 = vmatpush.msrb.mxu2 %v720_v34 }
 0x243   : > { %597 = vst.msk [vmem:[#allocation3 + $0x28] sm:$0x1] %vm324_vm5, %v584_v44  ;;  %764 = vmatpush.msrb.mxu0 %v692_v35  ;;  %v689_v44 = vld [vmem:[#allocation9 + $0x98] sm:$0xff]  ;;  %789 = vmatpush.msrb.mxu1 %v706_v43  ;;  %v688_v46 = vld [vmem:[#allocation9 + $0x90] sm:$0xff] }
 0x244   : > { %v646_v50 = vsel %vm373_vm7, %v644_v49, %v645_v48  ;;  %v618_v3 = vsel %vm344_vm6, %v616_v59, %v617_v55  ;;  %815 = vmatpush.msrb.mxu2 %v719_v37  ;;  %v704_v47 = vld [vmem:[#allocation9 + $0x110] sm:$0xff]  ;;  %v703_v49 = vld [vmem:[#allocation9 + $0x108] sm:$0xff] }
 0x245   : > { %654 = vrot.lane.b32.xlu1 %v646_v50, %s1228_s29  ;;  %765 = vmatpush.msrb.mxu0 %v691_v38  ;;  %v686_v50 = vld [vmem:[#allocation9 + $0x80] sm:$0xff] }
 0x246   : > { %816 = vmatpush.msrb.mxu2 %v718_v40  ;;  %790 = vmatpush.msrb.mxu1 %v705_v45 }
 0x247   : > { %766 = vmatpush.msrb.mxu0 %v690_v42 }
 0x248   : > { %v608_v54 = vld [vmem:[#allocation3 + $0x20] sm:$0x3]  ;;  %791 = vmatpush.msrb.mxu1 %v704_v47 }
 0x249   : > { %v650_v56 = vrot.slane %v608_v54, 2  ;;  %v1446_v57 = vld [vmem:[#allocation3 + $0x18] sm:$0xff]  ;;  %v604_v63 = vld [vmem:[#allocation3 + $0x20] sm:$0x1]  ;;  %767 = vmatpush.msrb.mxu0 %v689_v44 }
 0x24a   : > { %v648_v60 = vrot.slane %v1446_v57, 2  ;;  %v620_v62 = vrot.slane %v1446_v57, 1  ;;  %v605_v0 = vld [vmem:[#allocation3 + $0x28] sm:$0x1]  ;;  %v622_v8 = vrot.slane %v604_v63, 1  ;;  %792 = vmatpush.msrb.mxu1 %v703_v49 }
 0x24b   : > { %v651_v41 = vsel %vm373_vm7, %v645_v48, %v650_v56  ;;  %v609_v7 = vld [vmem:[#allocation3 + $0x28] sm:$0x3]  ;;  %v624_v9 = vrot.slane %v605_v0, 1  ;;  %768 = vmatpush.msrb.mxu0 %v688_v46 }
 0x24c   : > { %v649_v2 = vsel %vm373_vm7, %v647_v58, %v648_v60  ;;  %v621_v4 = vsel %vm344_vm6, %v619_v61, %v620_v62  ;;  %v652_v10 = vrot.slane %v609_v7, 2  ;;  %v623_v11 = vsel %vm344_vm6, %v617_v55, %v622_v8  ;;  %v687_v48 = vld [vmem:[#allocation9 + $0x88] sm:$0xff]  ;;  %793 = vmatpush.msrb.mxu1 %v702_v51 }
 0x24d   : > { %658 = vrot.lane.b32.xlu1 %v651_v41, %s1228_s29  ;;  %656 = vrot.lane.b32.xlu2 %v649_v2, %s1228_s29  ;;  %v1048_v5 = vpack.i.bf16 %v621_v4, %v618_v3  ;;  %v625_v12 = vsel %vm344_vm6, %v620_v62, %v624_v9  ;;  %v599_v62 = vld [vmem:[#allocation3 + $0x8] sm:$0xff]  ;;  %v1059_v9 = vld [vmem:[%s1518_s4] ss:$0 sm:$0xff] }
 0x24e   : > { %v653_v13 = vsel %vm373_vm7, %v648_v60, %v652_v10  ;;  %v1053_v14 = vpack.i.bf16 %v625_v12, %v623_v11  ;;  %769 = vmatpush.msrb.mxu0 %v687_v48 }
 0x24f   : > { %1049 = vrot.lane.b32.xlu0 %v1048_v5, %s1229_s11 }
 0x250   : > { %770 = vmatpush.msrb.mxu0 %v686_v50 }
 0x255   : > { %660 = vrot.lane.b32.xlu2 %v653_v13, %s1228_s29  ;;  %s1164_s29 = sshra.s32 %s848_s28, 4  ;;  %s1165_s29 = int_to_ptr.hbm [resolvable:$true] %s1164_s29 }
 0x256   : > { %s1166_s10 = scalar_lea.hbm %s1165_s29, 16  ;;  %p1171_p11 = scmp.lt.s32.totalorder %s1165_s29, %s1519_s5 }
 0x257   : > { %1054 = vrot.lane.b32.xlu0 %v1053_v14, %s1229_s11  ;;  %p1167_p1 = scmp.ne.s32.totalorder %s1165_s29, %s1166_s10  ;;  %p1172_p2 = scmp.lt.s32.totalorder %s1170_s12, %s1166_s10 }
 0x259   : > { %p1168_p4 = pnand %p1167_p1, %p1333_p3  ;;  %p1173_p9 = por %p1172_p2, %p1171_p11 }
 0x25b   : > { %p1169_p8 = pneg %p1168_p4 }
 0x25d   : > { %p1174_p10 = pnand %p1173_p9, %p1169_p8 }
 0x2a7   : > { %v657_v52 = vpop.permute.xlu2 %656 }
 0x2ac   : > { %v749_v10 = vpop.f32.mrf.mxu3 }
 0x2ad   : > { %v750_v11 = vadd.f32 %v1059_v9, %v749_v10 }
 0x2af   : > { %v661_v55 = vpop.permute.xlu2 %660 }
 0x2b7   : > { %v655_v53 = vpop.permute.xlu1 %654 }
 0x2b8   : > { %v662_v54 = vsel %vm392_vm9, %v655_v53, %v657_v52 }
 0x2b9   : > { %955 = vmatmul.msk.f32.vlgmr.msrb.gmra.mxu2 %vm459_vm8, %v662_v54 }
 0x2bf   : > { %v659_v56 = vpop.permute.xlu1 %658 }
 0x2c0   : > { %v663_v58 = vsel %vm392_vm9, %v659_v56, %v661_v55 }
 0x2c1   : > { %956 = vmatmul.msk.f32.gmra.mxu2 %vm459_vm8, %v663_v58  ;;  %v1050_v59 = vpop.permute.xlu0 %1049 }
 0x2c2   : > { %v1052_v60 = vunpack.i.h.bf16 %v1050_v59  ;;  %v1051_v61 = vunpack.i.l.bf16 %v1050_v59 }
 0x2c4   : > { %v666_v41 = vsel %vm279_vm0, %v599_v62, %v1051_v61  ;;  %v634_v63 = vsel %vm279_vm0, %v1051_v61, %v1052_v60 }
 0x2c5   : > { %771 = vmatmul.f32.vlgmr.msrb.gmra.mxu0 %v666_v41  ;;  %v668_v0 = vsel %vm392_vm9, %v634_v63, %v655_v53 }
 0x2c6   : > { %794 = vmatmul.f32.vlgmr.msrb.gmra.mxu1 %v668_v0 }
 0x2c9   : > { %v1055_v2 = vpop.permute.xlu0 %1054 }
 0x2ca   : > { %v1057_v3 = vunpack.i.h.bf16 %v1055_v2  ;;  %v1056_v4 = vunpack.i.l.bf16 %v1055_v2 }
 0x2cc   : > { %v667_v5 = vsel %vm279_vm0, %v1446_v57, %v1056_v4  ;;  %v635_v7 = vsel %vm279_vm0, %v1056_v4, %v1057_v3  ;;  %v752_v57 = vpop.f32.mrf.mxu3 }
 0x2cd   : > { %774 = vmatmul.f32.gmra.mxu0 %v667_v5  ;;  %v669_v8 = vsel %vm392_vm9, %v635_v7, %v659_v56  ;;  %v753_v18 = vadd.f32 %v1059_v9, %v752_v57 }
 0x2ce   : > { %797 = vmatmul.f32.gmra.mxu1 %v669_v8 }
 0x33c   : > { %v818_v15 = vpop.f32.mrf.mxu2 }
 0x342   : > { %v772_v12 = vpop.f32.mrf.mxu0 }
 0x343   : > { %v773_v13 = vadd.f32 %v772_v12, %v750_v11  ;;  %v795_v14 = vpop.f32.mrf.mxu1 }
 0x344   : > { %v821_v25 = vpop.f32.mrf.mxu2 }
 0x345   : > { %v796_v16 = vadd.f32 %v795_v14, %v773_v13 }
 0x347   : > { %v819_v17 = vadd.f32 %v818_v15, %v796_v16 }
 0x349   : > { %v826_v19 = vadd.f32 %v819_v17, %v1383_v1 }
 0x34a   : > { %v775_v20 = vpop.f32.mrf.mxu0 }
 0x34b   : > { %v828_v21 = vmax.f32 %v826_v19, 0.0  ;;  %v776_v22 = vadd.f32 %v775_v20, %v753_v18  ;;  %v798_v23 = vpop.f32.mrf.mxu1 }
 0x34d   : > { %830 = vst [vmem:[%s277_s30] sm:$0xff] %v828_v21  ;;  %v799_v24 = vadd.f32 %v798_v23, %v776_v22 }
 0x34f   : > { %v822_v26 = vadd.f32 %v821_v25, %v799_v24 }
 0x351   : > { %v827_v1 = vadd.f32 %v822_v26, %v1388_v6 }
 0x353   : > { %v829_v27 = vmax.f32 %v827_v1, 0.0 }
 0x355   : > { %831 = vst [vmem:[%s277_s30 + $0x8] sm:$0xff] %v829_v27 }
 0x356   : > { %1177 = shalt.err (!%p1174_p10)
}
 0x357   : > { %s1230_s8 = smov 128  }
 0x358   : > { %974 = dma.vmem_to_hbm [thread:$0]  (%p1333_p3), %s846_s16, 256, %s848_s28, %s833_s22, %s1230_s8, %s1230_s8, %s1227_s24  }
 0x359 PF: > { %s862_s27 = sand.u32 1, %s1208_s18   ;;  %p1527_p12 = scmp.ge.s32.totalorder %s1220_s21, 2 }
 0x35a   : > { %s863_s30 = scalar_lea.sflag [#allocation6], %s862_s27 }
 0x35b   : > { %p988_p13 = pnand %p1527_p12, %p1296_p6 }
 0x35d   : > { %p989_p0 = pneg %p988_p13 }
 0x35f   : > { %1203 = dma.done.wait (%p989_p0), %s863_s30, 256  }
 0x360   : > { %1205 = vsyncadd (%p989_p0), %s863_s30, 4294967040  ;;  %p19_p5 = scmp.ge.s32.totalorder %s1323_s14, 4   ;;  %s1528_s18 = smov %s1212_s19 }
 0x361   : > { %s1529_s19 = smov %s1216_s20  ;;  %s1530_s20 = smov %s1339_s23 }
 0x362   : > { %s1531_s21 = smov %s1323_s14  ;;  %21 = sbr.rel (!%p19_p5) target bundleno = 6 (0x6), region = 93 }
 0x367   :  { %869 = vsyncpa [#allocation5], 1 }
 0x368   :  { %871 = vsyncpa [#allocation5 + $0x1], 1 }
 0x369   :  { %872 = vsyncpa [#allocation8], 1 }
 0x36a   :  { %873 = vsyncpa [#allocation6], 1 }
 0x36b   :  { %875 = vsyncpa [#allocation6 + $0x1], 1 }

</bundles_post_ra>
